<compile_context>
chip_gen: v7x
topology: tpu7x:2x2x1
jax: 0.10.0
libtpu: 0.0.40
codegen_flags: <defaults>
</compile_context>

<pallas_src>
import functools

import jax
import jax.numpy as jnp
from jax.experimental import pallas as pl
from jax.experimental.pallas import tpu as pltpu

SUBLANE = 8
_VMEM_LIMIT_BYTES = 32 * 1024 * 1024  # safe scoped-VMEM limit on v5e/v6e/v7x


def _round_up(x, m):
    return (x + m - 1) // m * m


def _mlp_kernel(n_layers, *refs):
    """Fused MLP forward over one batch tile.

    refs = (x_ref, w0, b0, w1, b1, ..., w_{L-1}, b_{L-1}, out_ref)
    ReLU after every layer except the last (matches DummyDQNNet).
    """
    x_ref = refs[0]
    out_ref = refs[-1]
    param_refs = refs[1:-1]

    h = x_ref[...]
    for i in range(n_layers):
        w = param_refs[2 * i][...]
        b = param_refs[2 * i + 1][...].astype(jnp.float32)      # (1, out) row
        h = jnp.dot(h, w, preferred_element_type=jnp.float32) + b  # MXU, f32 acc
        if i < n_layers - 1:
            h = jnp.maximum(h, 0.0)                              # ReLU (VPU, f32)
    out_ref[...] = h.astype(out_ref.dtype)                       # true-width store


def reference_forward(x, params):
    """Pure-JAX reference (also the fused-XLA fallback for tiny batches)."""
    h = x
    for i, (w, b) in enumerate(params):
        h = h @ w + b
        if i < len(params) - 1:
            h = jnp.maximum(h, 0.0)
    return h


def _choose_batch_tile(batch, block_batch, sub):
    """Batch tile: multiple of `sub`, <= block_batch, and >=2 tiles when possible
    so the 'parallel' grid axis can shard across v7x's two TensorCores (extra
    grid step is ~0.35us on single-TC v5e/v6e, i.e. harmless)."""
    tb = min(block_batch, _round_up(batch, sub))
    tb = max(sub, _round_up(tb, sub))
    if batch > 2 * sub and pl.cdiv(batch, tb) < 2:
        tb = _round_up(pl.cdiv(batch, 2), sub)
    return tb


def dqn_net_forward(x, params, *, block_batch=1024, stream_dtype=None,
                    use_pallas=None, min_pallas_batch=256):
    """Forward pass of DummyDQNNet.

    params: list of (W, b) with W: (in, out), b: (out,).
    stream_dtype: dtype used for HBM traffic / MXU operands (e.g. jnp.bfloat16);
        accumulation, bias add and ReLU stay in f32. Default: x.dtype.
    Returns (batch, dim_act) in the streaming dtype.
    """
    batch, dim_state = x.shape
    n_layers = len(params)
    dim_act = params[-1][0].shape[1]

    if use_pallas is None:
        # Tiny batches are pure launch/DMA overhead in Pallas; let XLA fuse them.
        use_pallas = batch >= min_pallas_batch
    if not use_pallas:
        out = reference_forward(x, params)
        return out.astype(stream_dtype) if stream_dtype is not None else out

    dtype = jnp.dtype(stream_dtype) if stream_dtype is not None else jnp.dtype(x.dtype)
    itemsize = dtype.itemsize
    x = x.astype(dtype)

    # Flatten params; 2-D bias rows for TPU layout. No lane-padding of the last layer.
    flat = []
    layer_shapes = []
    for w, b in params:
        w = jnp.asarray(w, dtype)
        b = jnp.asarray(b, dtype).reshape(1, -1)
        flat.append(w)
        flat.append(b)
        layer_shapes.append((w.shape, b.shape))

    # Batch tiling (sublane granularity depends on packing: 8 for f32, 16 for bf16).
    sub = SUBLANE * max(1, 4 // itemsize)
    tb = _choose_batch_tile(batch, block_batch, sub)
    grid = (pl.cdiv(batch, tb),)

    # VMEM budget guard: x/out tiles and (constant-index) weights are double-buffered.
    param_bytes = sum(int(a.size) * a.dtype.itemsize for a in flat)
    vmem_needed = 2 * tb * (dim_state + dim_act) * itemsize + 2 * param_bytes
    if vmem_needed > _VMEM_LIMIT_BYTES:
        raise ValueError(
            f"DQN Pallas kernel needs ~{vmem_needed} B VMEM "
            f"(> {_VMEM_LIMIT_BYTES} B); reduce block_batch or tile over layers.")
    # TODO(synk): for very wide models, mark weight BlockSpecs pipeline_mode=pl.Buffered(1)
    # (constant index, never re-fetched) or switch to a K-tiled pipeline instead of
    # keeping all weights VMEM-resident.

    # x/out tiled over batch; weights/biases use constant index maps -> DMA'd once,
    # VMEM-resident across all batch tiles.
    in_specs = [pl.BlockSpec((tb, dim_state), lambda i: (i, 0))]
    for w_shape, b_shape in layer_shapes:
        in_specs.append(pl.BlockSpec(w_shape, lambda i: (0, 0)))
        in_specs.append(pl.BlockSpec(b_shape, lambda i: (0, 0)))
    out_specs = pl.BlockSpec((tb, dim_act), lambda i: (i, 0))

    flops = 2 * batch * sum(ws[0] * ws[1] for ws, _ in layer_shapes)
    bytes_accessed = int(batch * dim_state * itemsize
                         + param_bytes
                         + batch * dim_act * itemsize)

    out = pl.pallas_call(
        functools.partial(_mlp_kernel, n_layers),
        out_shape=jax.ShapeDtypeStruct((batch, dim_act), dtype),
        grid=grid,
        in_specs=in_specs,
        out_specs=out_specs,
        compiler_params=pltpu.CompilerParams(
            dimension_semantics=("parallel",),   # shards batch tiles across TCs (v7x)
            vmem_limit_bytes=_VMEM_LIMIT_BYTES,
        ),
        cost_estimate=pl.CostEstimate(
            flops=flops, bytes_accessed=bytes_accessed, transcendentals=0),
    )(x, *flat)

    return out


def init_params(key, dim_state, dim_act, depth=1, width=32):
    """Deterministic PyTorch-style init: U(-1/sqrt(fan_in), 1/sqrt(fan_in))."""
    dims = [dim_state] + [width] * depth + [dim_act]
    params = []
    for i in range(len(dims) - 1):
        fan_in, fan_out = dims[i], dims[i + 1]
        key, kw, kb = jax.random.split(key, 3)
        bound = 1.0 / jnp.sqrt(fan_in)
        w = jax.random.uniform(kw, (fan_in, fan_out), jnp.float32, -bound, bound)
        b = jax.random.uniform(kb, (fan_out,), jnp.float32, -bound, bound)
        params.append((w, b))
    return params


if __name__ == "__main__":
    # DummyDQNNet(dim_state=16, dim_act=4, depth=1, width=32, act=ReLU)
    dim_state, dim_act, depth, width = 16, 4, 1, 32

    key = jax.random.PRNGKey(0)
    key, kx = jax.random.split(key)
    params = init_params(key, dim_state, dim_act, depth=depth, width=width)

    # 1) Tiny batch (batch=2): force the Pallas path to exercise the kernel
    #    (default auto-dispatch would use the fused-XLA fallback here).
    x_small = jax.random.normal(kx, (2, dim_state), dtype=jnp.float32)
    out = jax.block_until_ready(dqn_net_forward(x_small, params, use_pallas=True))
    ref = reference_forward(x_small, params)
    assert out.shape == (2, dim_act), out.shape
    assert jnp.allclose(out, ref, atol=1e-5, rtol=1e-5), (out, ref)

    # 2) Larger batch, not a multiple of the tile: 2 batch tiles (parallel across
    #    TensorCores on v7x) + masked partial trailing block, f32 streaming.
    key, kx2 = jax.random.split(key)
    x_big = jax.random.normal(kx2, (650, dim_state), dtype=jnp.float32)
    out_big = jax.block_until_ready(dqn_net_forward(x_big, params))
    ref_big = reference_forward(x_big, params)
    assert out_big.shape == (650, dim_act), out_big.shape
    assert jnp.allclose(out_big, ref_big, atol=1e-5, rtol=1e-5)

    # 3) bf16-streamed variant (f32 MXU accumulation / f32 bias+ReLU) for
    #    memory-bound deployments.
    out_bf16 = jax.block_until_ready(
        dqn_net_forward(x_big, params, stream_dtype=jnp.bfloat16))
    assert out_bf16.shape == (650, dim_act)
    assert out_bf16.dtype == jnp.bfloat16
    assert jnp.allclose(out_bf16.astype(jnp.float32), ref_big, atol=5e-2, rtol=5e-2)

    print("KERNEL_OK")
</pallas_src>

<mosaic_0001>
module attributes {stable_mosaic.version = 11 : i64} {
  func.func @_mlp_kernel(%arg0: i32, %arg1: memref<8x16xf32, #tpu.memory_space<vmem>>, %arg2: memref<16x32xf32, #tpu.memory_space<vmem>>, %arg3: memref<1x32xf32, #tpu.memory_space<vmem>>, %arg4: memref<32x4xf32, #tpu.memory_space<vmem>>, %arg5: memref<1x4xf32, #tpu.memory_space<vmem>>, %arg6: memref<8x4xf32, #tpu.memory_space<vmem>>) attributes {dimension_semantics = [#tpu.dimension_semantics<parallel>], iteration_bounds = array<i64: 1>, scalar_prefetch = 0 : i64, scratch_operands = 0 : i64, tpu.core_type = #tpu.core_type<tc>, window_params = [{transform_indices = @transform_0, window_bounds = array<i64: 8, 16>}, {pipeline_mode = #tpu.pipeline_mode<synchronous>, transform_indices = @transform_1, window_bounds = array<i64: 16, 32>}, {pipeline_mode = #tpu.pipeline_mode<synchronous>, transform_indices = @transform_2, window_bounds = array<i64: 1, 32>}, {pipeline_mode = #tpu.pipeline_mode<synchronous>, transform_indices = @transform_3, window_bounds = array<i64: 32, 4>}, {pipeline_mode = #tpu.pipeline_mode<synchronous>, transform_indices = @transform_4, window_bounds = array<i64: 1, 4>}, {transform_indices = @transform_5, window_bounds = array<i64: 8, 4>}]} {
    %c0 = arith.constant 0 : index
    %c0_0 = arith.constant 0 : index
    %0 = vector.load %arg1[%c0, %c0_0] : memref<8x16xf32, #tpu.memory_space<vmem>>, vector<8x16xf32>
    %c0_1 = arith.constant 0 : index
    %c0_2 = arith.constant 0 : index
    %1 = vector.load %arg2[%c0_1, %c0_2] : memref<16x32xf32, #tpu.memory_space<vmem>>, vector<16x32xf32>
    %c0_3 = arith.constant 0 : index
    %c0_4 = arith.constant 0 : index
    %2 = vector.load %arg3[%c0_3, %c0_4] : memref<1x32xf32, #tpu.memory_space<vmem>>, vector<1x32xf32>
    %cst = arith.constant dense<0.000000e+00> : vector<8x32xf32>
    %3 = tpu.matmul %0, %1, %cst {dimension_numbers = #tpu.dot_dimension_numbers<[1], [0], [0], [1], [0, 0, 1, 1], [], []>} : vector<8x16xf32>, vector<16x32xf32>, vector<8x32xf32> -> vector<8x32xf32>
    %4 = vector.broadcast %2 : vector<1x32xf32> to vector<8x32xf32>
    %5 = arith.addf %3, %4 : vector<8x32xf32>
    %cst_5 = arith.constant 0.000000e+00 : f32
    %6 = vector.broadcast %cst_5 : f32 to vector<8x32xf32>
    %7 = arith.maximumf %5, %6 : vector<8x32xf32>
    %c0_6 = arith.constant 0 : index
    %c0_7 = arith.constant 0 : index
    %8 = vector.load %arg4[%c0_6, %c0_7] : memref<32x4xf32, #tpu.memory_space<vmem>>, vector<32x4xf32>
    %c0_8 = arith.constant 0 : index
    %c0_9 = arith.constant 0 : index
    %9 = vector.load %arg5[%c0_8, %c0_9] : memref<1x4xf32, #tpu.memory_space<vmem>>, vector<1x4xf32>
    %cst_10 = arith.constant dense<0.000000e+00> : vector<8x4xf32>
    %10 = tpu.matmul %7, %8, %cst_10 {dimension_numbers = #tpu.dot_dimension_numbers<[1], [0], [0], [1], [0, 0, 1, 1], [], []>} : vector<8x32xf32>, vector<32x4xf32>, vector<8x4xf32> -> vector<8x4xf32>
    %11 = vector.broadcast %9 : vector<1x4xf32> to vector<8x4xf32>
    %12 = arith.addf %10, %11 : vector<8x4xf32>
    %c0_11 = arith.constant 0 : index
    %c0_12 = arith.constant 0 : index
    %13 = vector.load %arg6[%c0_11, %c0_12] : memref<8x4xf32, #tpu.memory_space<vmem>>, vector<8x4xf32>
    tpu.vector_store %arg6[%c0_11, %c0_12], %12 {strides = array<i32>} : memref<8x4xf32, #tpu.memory_space<vmem>>, vector<8x4xf32>,
    return
  }
  func.func @transform_0(%arg0: i32) -> (i32, i32) {
    %c0_i32 = arith.constant 0 : i32
    %c0_i32_0 = arith.constant 0 : i32
    return %arg0, %c0_i32 : i32, i32
  }
  func.func @transform_1(%arg0: i32) -> (i32, i32) {
    %c0_i32 = arith.constant 0 : i32
    %c0_i32_0 = arith.constant 0 : i32
    %c0_i32_1 = arith.constant 0 : i32
    return %c0_i32, %c0_i32_0 : i32, i32
  }
  func.func @transform_2(%arg0: i32) -> (i32, i32) {
    %c0_i32 = arith.constant 0 : i32
    %c0_i32_0 = arith.constant 0 : i32
    %c0_i32_1 = arith.constant 0 : i32
    return %c0_i32, %c0_i32_0 : i32, i32
  }
  func.func @transform_3(%arg0: i32) -> (i32, i32) {
    %c0_i32 = arith.constant 0 : i32
    %c0_i32_0 = arith.constant 0 : i32
    %c0_i32_1 = arith.constant 0 : i32
    return %c0_i32, %c0_i32_0 : i32, i32
  }
  func.func @transform_4(%arg0: i32) -> (i32, i32) {
    %c0_i32 = arith.constant 0 : i32
    %c0_i32_0 = arith.constant 0 : i32
    %c0_i32_1 = arith.constant 0 : i32
    return %c0_i32, %c0_i32_0 : i32, i32
  }
  func.func @transform_5(%arg0: i32) -> (i32, i32) {
    %c0_i32 = arith.constant 0 : i32
    %c0_i32_0 = arith.constant 0 : i32
    return %arg0, %c0_i32 : i32, i32
  }
}

</mosaic_0001>

<bundles_post_ra>
// kernel: tpu_custom_call.1
= control target key start
LH: loop header
LB: loop body
LE: loop exit
PB: predicated region body
PF: predicated region fallthrough
CT: control target
= control target key end

     0   :  { %10 = vsyncpa [#allocation3], 0  ;;  %v278_v2 = vmov 0.0|0.0   ;;  %vm279_vm0 = vmmov 0   ;;  %v280_v6 = vmov 0.0   ;;  %vm31_vm1 = vcmask 130048   ;;  %s353_s0 = inlined_call_operand.vmem [shape: f32[2,16], index: 0, kind: input, shape index: {}]   ;;  %s354_s1 = inlined_call_operand.vmem [shape: f32[16,32], index: 1, kind: input, shape index: {}]   ;;  %s355_s2 = inlined_call_operand.vmem [shape: f32[1,32], index: 2, kind: input, shape index: {}]   ;;  %s356_s3 = inlined_call_operand.vmem [shape: f32[32,4], index: 3, kind: input, shape index: {}]   ;;  %s357_s4 = inlined_call_operand.vmem [shape: f32[1,4], index: 4, kind: input, shape index: {}]   ;;  %s358_s5 = inlined_call_operand.hbm [shape: f32[2,4], index: 5, kind: output, shape index: {}]  }
   0x1   :  { %v22_v0 = vld [vmem:[%s354_s1] sm:$0xff]  ;;  %v23_v1 = vld [vmem:[%s354_s1 + $0x8] sm:$0xff]  ;;  %239 = vmatprep.subr.bf16.mxu0 %v278_v2  ;;  %242 = vmatprep.subr.bf16.mxu1 %v278_v2  ;;  %v108_v9 = vld [vmem:[%s356_s3 + $0x10] sm:$0xff]  ;;  %vm117_vm2 = vcmask 261120   ;;  %vm191_vm3 = vcmask 31744  }
   0x2   :  { %v240_v3 = vpack.c.bf16 %v23_v1, %v22_v0  ;;  %v106_v4 = vld [vmem:[%s356_s3] sm:$0xff]  ;;  %v107_v5 = vld [vmem:[%s356_s3 + $0x8] sm:$0xff]  ;;  %225 = vmatprep.mubr.msk.f32.mxu0 %vm279_vm0, %v280_v6  ;;  %236 = vmatprep.mubr.msk.f32.mxu1 %vm279_vm0, %v280_v6  ;;  %v109_v10 = vld [vmem:[%s356_s3 + $0x18] sm:$0xff] }
   0x3   :  { %v243_v7 = vpack.c.bf16 %v107_v5, %v106_v4  ;;  %v21_v8 = vld [vmem:[%s353_s0] sm:$0xff]  ;;  %v246_v11 = vpack.c.bf16 %v109_v10, %v108_v9 }
   0x4   :  { %241 = vmatpush3.bf16.msra.mxu0 %v240_v3  ;;  %v209_v12 = vld [vmem:[%s355_s2] ss:$0 sm:$0xff] }
   0x5   :  { %244 = vmatpush3.bf16.msra.mxu1 %v243_v7  ;;  %v211_v17 = vld [vmem:[%s357_s4] ss:$0 sm:$0xff] }
   0x6   :  { %245 = vmatprep.subr.bf16.mxu1 %v278_v2 }
   0x7   :  { %226 = vmatmul.mubr.msk.f32.vlgmr.msra.gmra.mrb[0].mxu0 %vm31_vm1, %v21_v8 }
   0x9   :  { %247 = vmatpush3.bf16.msra.mxu1 %v246_v11 }
  0xda   :  { %v101_v13 = vpop.f32.mrb[0].mxu0 }
  0xdb   :  { %v102_v14 = vadd.f32 %v209_v12, %v101_v13  ;;  %v227_v15 = vpop.f32.mrb[1].mxu0 }
  0xdd   :  { %v105_v16 = vmax.f32 %v102_v14, 0.0 }
  0xdf   :  { %237 = vmatmul.mubr.msk.f32.vlgmr.msra.gmra.mrb[0].mxu1 %vm117_vm2, %v105_v16 }
 0x1b2   :  { %v187_v18 = vpop.f32.mrb[0].mxu1 }
 0x1b3   :  { %v188_v19 = vadd.f32 %v211_v17, %v187_v18  ;;  %v238_v20 = vpop.f32.mrb[1].mxu1 }
 0x1b5   :  { %192 = vst.msk [vmem:[#allocation2] sm:$0xff] %vm191_vm3, %v188_v19 }
 0x1b6   :  { %197 = vsyncadd [#allocation3], 96  ;;  %s281_s3 = smov [#allocation2]  }
 0x1b7   :  { %s198_s9 = sshll.u32 %s281_s3, 4  ;;  %s199_s9 = int_to_ptr.vmem [resolvable:$true] %s198_s9 }
 0x1b8   :  { %s254_s2 = scalar_lea.vmem %s199_s9, 32  ;;  %s258_s10 = scalar_lea.vmem %s199_s9, 128 }
 0x1b9   :  { %p255_p0 = scmp.ne.s32.totalorder %s199_s9, %s254_s2  ;;  %p259_p1 = scmp.lt.s32.totalorder %s199_s9, %s199_s9 }
 0x1ba   :  { %p260_p2 = scmp.lt.s32.totalorder %s258_s10, %s254_s2 }
 0x1bc   :  { %p261_p3 = por %p260_p2, %p259_p1 }
 0x1be   :  { %p262_p4 = pnand %p261_p3, %p255_p0 }
 0x1c0   :  { %265 = shalt.err (!%p262_p4)
}
 0x1c1   :  { %s266_s4 = scalar_lea.hbm %s358_s5, 32 }
 0x1c2   :  { %p267_p5 = scmp.ne.s32.totalorder %s358_s5, %s266_s4  ;;  %p270_p6 = scmp.lt.u32.totalorder %s266_s4, %s358_s5 }
 0x1c4   :  { %p272_p7 = pnand %p270_p6, %p267_p5 }
 0x1c6   :  { %275 = shalt.err (!%p272_p7)
}
 0x1c7   :  { %s282_s17 = smov 32   ;;  %s283_s18 = smov 2  }
 0x1c8   :  { %204 = dma.vmem_to_hbm [thread:$0]  %s199_s9, 32, %s358_s5, [#allocation3], %s282_s17, %s282_s17, %s283_s18  }
 0x1c9   :  { %276 = dma.done.wait [#allocation3], 128  }
 0x1ca   :  { %277 = vsyncadd [#allocation3], 4294967168 }
 0x1cb   :  { %208 = vsyncpa [#allocation3], 1 }

</bundles_post_ra>
